<compile_context>
chip_gen: v7x
topology: tpu7x:2x2x1
jax: 0.10.0
libtpu: 0.0.40
codegen_flags: <defaults>
</compile_context>

<pallas_src>
import jax
import jax.numpy as jnp
from jax.experimental import pallas as pl
from jax.experimental.pallas import tpu as pltpu

EPS = 1e-3


def _bn_kernel(x_ref, gb_ref, o_ref):
    # x_ref:  (N, c_blk, HW)
    # gb_ref: (2, c_blk, 1)   row 0 = gamma, row 1 = beta
    n, _, hw = x_ref.shape
    inv_m = 1.0 / (n * hw)

    # Pass 1: per-channel mean (reduce over batch and spatial axes).
    mean = jnp.sum(x_ref[...].astype(jnp.float32),
                   axis=(0, 2), keepdims=True) * inv_m          # (1, c_blk, 1)

    # Pass 2: centered sum of squares (fresh VMEM read -> short vreg live
    # range; two-pass variance avoids catastrophic cancellation).
    xc = x_ref[...].astype(jnp.float32) - mean
    var = jnp.sum(xc * xc, axis=(0, 2), keepdims=True) * inv_m   # biased var
    inv_std = jax.lax.rsqrt(var + EPS)

    # Fold affine params into per-channel scale/shift.
    gamma = gb_ref[0:1, :, :]
    beta = gb_ref[1:2, :, :]
    scale = inv_std * gamma                                      # (1, c_blk, 1)
    shift = beta - mean * scale                                  # (1, c_blk, 1)

    # Pass 3: fresh read for the store; 2 VPU ops per element.
    o_ref[...] = (x_ref[...].astype(jnp.float32) * scale + shift).astype(o_ref.dtype)


def batchnorm2d_pallas(x_nchw, gamma, beta, *, c_blk=None):
    """Training-mode BatchNorm2d forward. x_nchw: [N, C, H, W]."""
    N, C, H, W = x_nchw.shape
    HW = H * W

    hw_pad = -(-HW // 128) * 128  # lane padding of the last dim

    if c_blk is None:
        # Default: whole channel range in a single grid step (this workload is
        # per-step-overhead bound, not bandwidth bound).
        c_blk = C
        # VMEM guard: if one tile (padded) would exceed ~8 MiB, shrink the
        # channel block (multiples of 8 to satisfy the sublane constraint).
        def _tile_bytes(cb):
            cb_pad = -(-cb // 8) * 8
            return N * cb_pad * hw_pad * 4
        while _tile_bytes(c_blk) > (8 << 20) and c_blk > 8:
            c_blk = max(8, (c_blk // 2 // 8) * 8)

    x_3d = x_nchw.reshape(N, C, HW)                # free reshape, no transpose
    gb = jnp.stack(
        [gamma.astype(jnp.float32), beta.astype(jnp.float32)], axis=0
    ).reshape(2, C, 1)                             # one array -> one DMA

    grid = (pl.cdiv(C, c_blk),)

    # VMEM budget: in + out tiles, double-buffered, plus slack.
    cb_pad = -(-c_blk // 8) * 8
    tile_bytes = N * cb_pad * hw_pad * 4
    vmem_bytes = min(64 << 20, max(32 << 20, 5 * tile_bytes + (2 << 20)))

    cost = pl.CostEstimate(
        flops=5 * N * C * HW,          # 2 reduce passes + scale/shift apply
        transcendentals=C,             # per-channel rsqrt
        bytes_accessed=8 * N * C * HW,  # read + write, f32
    )

    out_3d = pl.pallas_call(
        _bn_kernel,
        out_shape=jax.ShapeDtypeStruct((N, C, HW), x_nchw.dtype),
        grid_spec=pltpu.PrefetchScalarGridSpec(
            num_scalar_prefetch=0,
            grid=grid,
            in_specs=[
                pl.BlockSpec((N, c_blk, HW), lambda c: (0, c, 0)),
                pl.BlockSpec((2, c_blk, 1), lambda c: (0, c, 0)),
            ],
            out_specs=pl.BlockSpec((N, c_blk, HW), lambda c: (0, c, 0)),
        ),
        compiler_params=pltpu.CompilerParams(
            dimension_semantics=("parallel",),
            vmem_limit_bytes=vmem_bytes,
        ),
        cost_estimate=cost,
    )(x_3d, gb)

    return out_3d.reshape(N, C, H, W)


def _reference(x_nchw, gamma, beta):
    mean = jnp.mean(x_nchw, axis=(0, 2, 3), keepdims=True)
    var = jnp.var(x_nchw, axis=(0, 2, 3), keepdims=True)  # biased (training BN)
    g = gamma.reshape(1, -1, 1, 1)
    b = beta.reshape(1, -1, 1, 1)
    return (x_nchw - mean) / jnp.sqrt(var + EPS) * g + b


if __name__ == "__main__":
    key = jax.random.PRNGKey(0)
    kx, kg, kb = jax.random.split(key, 3)

    # Shape implied by the module: BatchNorm2d(184) on [1, 184, 14, 14].
    N, C, H, W = 1, 184, 14, 14
    x = jax.random.normal(kx, (N, C, H, W), dtype=jnp.float32)
    # PyTorch default init is gamma=1, beta=0; perturb deterministically so the
    # affine path is exercised.
    gamma = 1.0 + 0.1 * jax.random.normal(kg, (C,), dtype=jnp.float32)
    beta = 0.1 * jax.random.normal(kb, (C,), dtype=jnp.float32)

    out = batchnorm2d_pallas(x, gamma, beta)
    out = jax.block_until_ready(out)

    ref = _reference(x, gamma, beta)
    assert out.shape == (N, C, H, W)
    assert jnp.allclose(out, ref, atol=1e-4, rtol=1e-4)
    print("KERNEL_OK")
</pallas_src>

<mosaic_0001>
module attributes {stable_mosaic.version = 11 : i64} {
  func.func @_bn_kernel(%arg0: i32, %arg1: memref<1x184x196xf32, #tpu.memory_space<vmem>>, %arg2: memref<2x184x1xf32, #tpu.memory_space<vmem>>, %arg3: memref<1x184x196xf32, #tpu.memory_space<vmem>>) attributes {dimension_semantics = [#tpu.dimension_semantics<parallel>], iteration_bounds = array<i64: 1>, scalar_prefetch = 0 : i64, scratch_operands = 0 : i64, tpu.core_type = #tpu.core_type<tc>, window_params = [{transform_indices = @transform_0, window_bounds = array<i64: 1, 184, 196>}, {transform_indices = @transform_1, window_bounds = array<i64: 2, 184, 1>}, {transform_indices = @transform_2, window_bounds = array<i64: 1, 184, 196>}]} {
    %c0 = arith.constant 0 : index
    %c0_0 = arith.constant 0 : index
    %c0_1 = arith.constant 0 : index
    %0 = vector.load %arg1[%c0, %c0_0, %c0_1] : memref<1x184x196xf32, #tpu.memory_space<vmem>>, vector<1x184x196xf32>
    %cst = arith.constant dense<0.000000e+00> : vector<184xf32>
    %1 = vector.multi_reduction <add>, %0, %cst [0, 2] : vector<1x184x196xf32> to vector<184xf32>
    %2 = vector.shape_cast %1 : vector<184xf32> to vector<1x184x1xf32>
    %cst_2 = arith.constant 0.00510204071 : f32
    %3 = vector.broadcast %cst_2 : f32 to vector<1x184x1xf32>
    %4 = arith.mulf %2, %3 : vector<1x184x1xf32>
    %c0_3 = arith.constant 0 : index
    %c0_4 = arith.constant 0 : index
    %c0_5 = arith.constant 0 : index
    %5 = vector.load %arg1[%c0_3, %c0_4, %c0_5] : memref<1x184x196xf32, #tpu.memory_space<vmem>>, vector<1x184x196xf32>
    %6 = vector.broadcast %4 : vector<1x184x1xf32> to vector<1x184x196xf32>
    %7 = arith.subf %5, %6 : vector<1x184x196xf32>
    %8 = arith.mulf %7, %7 : vector<1x184x196xf32>
    %cst_6 = arith.constant dense<0.000000e+00> : vector<184xf32>
    %9 = vector.multi_reduction <add>, %8, %cst_6 [0, 2] : vector<1x184x196xf32> to vector<184xf32>
    %10 = vector.shape_cast %9 : vector<184xf32> to vector<1x184x1xf32>
    %cst_7 = arith.constant 0.00510204071 : f32
    %11 = vector.broadcast %cst_7 : f32 to vector<1x184x1xf32>
    %12 = arith.mulf %10, %11 : vector<1x184x1xf32>
    %cst_8 = arith.constant 1.000000e-03 : f32
    %13 = vector.broadcast %cst_8 : f32 to vector<1x184x1xf32>
    %14 = arith.addf %12, %13 : vector<1x184x1xf32>
    %15 = math.rsqrt %14 : vector<1x184x1xf32>
    %c0_9 = arith.constant 0 : index
    %c0_10 = arith.constant 0 : index
    %c0_11 = arith.constant 0 : index
    %16 = vector.load %arg2[%c0_9, %c0_10, %c0_11] : memref<2x184x1xf32, #tpu.memory_space<vmem>>, vector<1x184x1xf32>
    %c1 = arith.constant 1 : index
    %c0_12 = arith.constant 0 : index
    %c0_13 = arith.constant 0 : index
    %17 = vector.load %arg2[%c1, %c0_12, %c0_13] : memref<2x184x1xf32, #tpu.memory_space<vmem>>, vector<1x184x1xf32>
    %18 = arith.mulf %15, %16 : vector<1x184x1xf32>
    %19 = arith.mulf %4, %18 : vector<1x184x1xf32>
    %20 = arith.subf %17, %19 : vector<1x184x1xf32>
    %c0_14 = arith.constant 0 : index
    %c0_15 = arith.constant 0 : index
    %c0_16 = arith.constant 0 : index
    %21 = vector.load %arg1[%c0_14, %c0_15, %c0_16] : memref<1x184x196xf32, #tpu.memory_space<vmem>>, vector<1x184x196xf32>
    %22 = vector.broadcast %18 : vector<1x184x1xf32> to vector<1x184x196xf32>
    %23 = arith.mulf %21, %22 : vector<1x184x196xf32>
    %24 = vector.broadcast %20 : vector<1x184x1xf32> to vector<1x184x196xf32>
    %25 = arith.addf %23, %24 : vector<1x184x196xf32>
    %c0_17 = arith.constant 0 : index
    %c0_18 = arith.constant 0 : index
    %c0_19 = arith.constant 0 : index
    %26 = vector.load %arg3[%c0_17, %c0_18, %c0_19] : memref<1x184x196xf32, #tpu.memory_space<vmem>>, vector<1x184x196xf32>
    tpu.vector_store %arg3[%c0_17, %c0_18, %c0_19], %25 {strides = array<i32>} : memref<1x184x196xf32, #tpu.memory_space<vmem>>, vector<1x184x196xf32>,
    return
  }
  func.func @transform_0(%arg0: i32) -> (i32, i32, i32) {
    %c0_i32 = arith.constant 0 : i32
    %c0_i32_0 = arith.constant 0 : i32
    %c0_i32_1 = arith.constant 0 : i32
    return %c0_i32, %arg0, %c0_i32_0 : i32, i32, i32
  }
  func.func @transform_1(%arg0: i32) -> (i32, i32, i32) {
    %c0_i32 = arith.constant 0 : i32
    %c0_i32_0 = arith.constant 0 : i32
    %c0_i32_1 = arith.constant 0 : i32
    return %c0_i32, %arg0, %c0_i32_0 : i32, i32, i32
  }
  func.func @transform_2(%arg0: i32) -> (i32, i32, i32) {
    %c0_i32 = arith.constant 0 : i32
    %c0_i32_0 = arith.constant 0 : i32
    %c0_i32_1 = arith.constant 0 : i32
    return %c0_i32, %arg0, %c0_i32_0 : i32, i32, i32
  }
}

</mosaic_0001>

<bundles_post_ra>
// kernel: tpu_custom_call.1
= control target key start
LH: loop header
LB: loop body
LE: loop exit
PB: predicated region body
PF: predicated region fallthrough
CT: control target
= control target key end

     0   :  { %vm58_vm0 = vcmask 556032   ;;  %s2021_s0 = inlined_call_operand.vmem [shape: f32[1,184,196], index: 0, kind: input, shape index: {}]   ;;  %s2022_s1 = inlined_call_operand.vmem [shape: f32[2,184,1], index: 1, kind: input, shape index: {}]   ;;  %s2023_s2 = inlined_call_operand.hbm [shape: f32[1,184,196], index: 2, kind: output, shape index: {}]  }
   0x1   :  { %v1094_v0 = vld [vmem:[%s2021_s0] sm:$0xff]  ;;  %v1099_v1 = vld [vmem:[%s2021_s0 + $0x8] sm:$0xff]  ;;  %v1116_v5 = vld [vmem:[%s2021_s0 + $0x10] sm:$0xff] }
   0x2   :  { %v1104_v2 = vld [vmem:[%s2021_s0 + $0x20] sm:$0xff]  ;;  %v59_v3 = vsel %vm58_vm0, %v1099_v1, 0.0  ;;  %v1111_v4 = vld [vmem:[%s2021_s0 + $0x28] sm:$0xff]  ;;  %v1121_v6 = vld [vmem:[%s2021_s0 + $0x18] sm:$0xff] }
   0x3   :  { %v60_v7 = vadd.f32 %v59_v3, %v1094_v0  ;;  %v67_v8 = vsel %vm58_vm0, %v1111_v4, 0.0  ;;  %v63_v9 = vsel %vm58_vm0, %v1121_v6, 0.0  ;;  %v1131_v10 = vld [vmem:[%s2021_s0 + $0x30] sm:$0xff]  ;;  %v1136_v11 = vld [vmem:[%s2021_s0 + $0x38] sm:$0xff]  ;;  %v1144_v14 = vld [vmem:[%s2021_s0 + $0x48] sm:$0xff] }
   0x4   :  { %v68_v12 = vadd.f32 %v67_v8, %v1104_v2  ;;  %v71_v13 = vsel %vm58_vm0, %v1136_v11, 0.0  ;;  %v1149_v15 = vld [vmem:[%s2021_s0 + $0x58] sm:$0xff]  ;;  %v64_v16 = vadd.f32 %v63_v9, %v1116_v5  ;;  %v1156_v18 = vld [vmem:[%s2021_s0 + $0x40] sm:$0xff]  ;;  %v75_v19 = vsel %vm58_vm0, %v1144_v14, 0.0  ;;  %v1163_v20 = vld [vmem:[%s2021_s0 + $0x50] sm:$0xff] }
   0x5   :  { %61 = vadd.xlane.f32.xlu0 %v60_v7  ;;  %v72_v17 = vadd.f32 %v71_v13, %v1131_v10  ;;  %v79_v21 = vsel %vm58_vm0, %v1149_v15, 0.0  ;;  %v1170_v22 = vld [vmem:[%s2021_s0 + $0x68] sm:$0xff]  ;;  %v1175_v23 = vld [vmem:[%s2021_s0 + $0x78] sm:$0xff]  ;;  %v76_v24 = vadd.f32 %v75_v19, %v1156_v18  ;;  %v1182_v26 = vld [vmem:[%s2021_s0 + $0x60] sm:$0xff] }
   0x6   :  { %69 = vadd.xlane.f32.xlu1 %v68_v12  ;;  %v80_v25 = vadd.f32 %v79_v21, %v1163_v20  ;;  %v83_v27 = vsel %vm58_vm0, %v1170_v22, 0.0  ;;  %v1189_v28 = vld [vmem:[%s2021_s0 + $0x70] sm:$0xff]  ;;  %v87_v29 = vsel %vm58_vm0, %v1175_v23, 0.0  ;;  %v1196_v30 = vld [vmem:[%s2021_s0 + $0x88] sm:$0xff]  ;;  %v1201_v31 = vld [vmem:[%s2021_s0 + $0x98] sm:$0xff] }
   0x7   :  { %v84_v32 = vadd.f32 %v83_v27, %v1182_v26  ;;  %v88_v33 = vadd.f32 %v87_v29, %v1189_v28  ;;  %v1208_v34 = vld [vmem:[%s2021_s0 + $0x80] sm:$0xff]  ;;  %v91_v35 = vsel %vm58_vm0, %v1196_v30, 0.0  ;;  %v1215_v36 = vld [vmem:[%s2021_s0 + $0x90] sm:$0xff]  ;;  %v95_v37 = vsel %vm58_vm0, %v1201_v31, 0.0  ;;  %v1222_v38 = vld [vmem:[%s2021_s0 + $0xa8] sm:$0xff] }
   0x8   :  { %v1227_v39 = vld [vmem:[%s2021_s0 + $0xb8] sm:$0xff] }
   0x9   :  { %65 = vadd.xlane.f32.xlu0 %v64_v16 }
   0xa   :  { %73 = vadd.xlane.f32.xlu1 %v72_v17 }
   0xd   :  { %77 = vadd.xlane.f32.xlu0 %v76_v24 }
   0xe   :  { %81 = vadd.xlane.f32.xlu1 %v80_v25 }
   0xf   :  { %7 = vsyncpa [#allocation3], 0  ;;  %v92_v40 = vadd.f32 %v91_v35, %v1208_v34  ;;  %v96_v41 = vadd.f32 %v95_v37, %v1215_v36  ;;  %v1234_v42 = vld [vmem:[%s2021_s0 + $0xa0] sm:$0xff]  ;;  %v99_v43 = vsel %vm58_vm0, %v1222_v38, 0.0  ;;  %v1241_v44 = vld [vmem:[%s2021_s0 + $0xb0] sm:$0xff]  ;;  %v103_v45 = vsel %vm58_vm0, %v1227_v39, 0.0 }
  0x10   :  { %v1248_v46 = vld [vmem:[%s2021_s0 + $0xc8] sm:$0xff]  ;;  %v1253_v47 = vld [vmem:[%s2021_s0 + $0xd8] sm:$0xff]  ;;  %v100_v48 = vadd.f32 %v99_v43, %v1234_v42  ;;  %v104_v49 = vadd.f32 %v103_v45, %v1241_v44  ;;  %v1260_v50 = vld [vmem:[%s2021_s0 + $0xc0] sm:$0xff]  ;;  %s1073_s25 = smov [#allocation2]  }
  0x11   :  { %85 = vadd.xlane.f32.xlu0 %v84_v32  ;;  %v107_v51 = vsel %vm58_vm0, %v1248_v46, 0.0  ;;  %v1267_v52 = vld [vmem:[%s2021_s0 + $0xd0] sm:$0xff]  ;;  %v111_v53 = vsel %vm58_vm0, %v1253_v47, 0.0  ;;  %v1274_v54 = vld [vmem:[%s2021_s0 + $0xe8] sm:$0xff]  ;;  %v1279_v55 = vld [vmem:[%s2021_s0 + $0xf8] sm:$0xff]  ;;  %s916_s26 = sshll.u32 %s1073_s25, 4  ;;  %s917_s26 = int_to_ptr.vmem [resolvable:$true] %s916_s26 }
  0x12   :  { %89 = vadd.xlane.f32.xlu1 %v88_v33  ;;  %v108_v56 = vadd.f32 %v107_v51, %v1260_v50  ;;  %v112_v57 = vadd.f32 %v111_v53, %v1267_v52  ;;  %v1286_v58 = vld [vmem:[%s2021_s0 + $0xe0] sm:$0xff]  ;;  %v115_v59 = vsel %vm58_vm0, %v1274_v54, 0.0  ;;  %v1293_v60 = vld [vmem:[%s2021_s0 + $0xf0] sm:$0xff]  ;;  %v119_v61 = vsel %vm58_vm0, %v1279_v55, 0.0  ;;  %v1300_v62 = vld [vmem:[%s2021_s0 + $0x108] sm:$0xff]  ;;  %s1048_s3 = scalar_lea.vmem %s917_s26, 5888  ;;  %p1053_p1 = scmp.lt.s32.totalorder %s917_s26, %s917_s26 }
  0x13   :  { %v1305_v63 = vld [vmem:[%s2021_s0 + $0x118] sm:$0xff]  ;;  %v116_v3 = vadd.f32 %v115_v59, %v1286_v58  ;;  %v120_v7 = vadd.f32 %v119_v61, %v1293_v60  ;;  %v1312_v8 = vld [vmem:[%s2021_s0 + $0x100] sm:$0xff]  ;;  %v123_v9 = vsel %vm58_vm0, %v1300_v62, 0.0  ;;  %v1319_v12 = vld [vmem:[%s2021_s0 + $0x110] sm:$0xff]  ;;  %p1049_p0 = scmp.ne.s32.totalorder %s917_s26, %s1048_s3  ;;  %p1054_p2 = scmp.lt.s32.totalorder %s1048_s3, %s1048_s3 }
  0x14   :  { %v127_v13 = vsel %vm58_vm0, %v1305_v63, 0.0  ;;  %v1326_v16 = vld [vmem:[%s2021_s0 + $0x128] sm:$0xff]  ;;  %v1331_v17 = vld [vmem:[%s2021_s0 + $0x138] sm:$0xff]  ;;  %v124_v19 = vadd.f32 %v123_v9, %v1312_v8  ;;  %v1338_v24 = vld [vmem:[%s2021_s0 + $0x120] sm:$0xff] }
  0x15   :  { %93 = vadd.xlane.f32.xlu0 %v92_v40  ;;  %v128_v21 = vadd.f32 %v127_v13, %v1319_v12  ;;  %v131_v25 = vsel %vm58_vm0, %v1326_v16, 0.0  ;;  %v1345_v27 = vld [vmem:[%s2021_s0 + $0x130] sm:$0xff]  ;;  %v135_v29 = vsel %vm58_vm0, %v1331_v17, 0.0  ;;  %v1352_v32 = vld [vmem:[%s2021_s0 + $0x148] sm:$0xff]  ;;  %v1357_v33 = vld [vmem:[%s2021_s0 + $0x158] sm:$0xff]  ;;  %p1055_p3 = por %p1054_p2, %p1053_p1 }
  0x16   :  { %97 = vadd.xlane.f32.xlu1 %v96_v41  ;;  %v132_v35 = vadd.f32 %v131_v25, %v1338_v24  ;;  %v136_v37 = vadd.f32 %v135_v29, %v1345_v27  ;;  %v1364_v40 = vld [vmem:[%s2021_s0 + $0x140] sm:$0xff]  ;;  %v139_v41 = vsel %vm58_vm0, %v1352_v32, 0.0  ;;  %v1371_v43 = vld [vmem:[%s2021_s0 + $0x150] sm:$0xff]  ;;  %v143_v45 = vsel %vm58_vm0, %v1357_v33, 0.0 }
  0x17   :  { %v144_v51 = vadd.f32 %v143_v45, %v1371_v43  ;;  %v1385_v53 = vld [vmem:[%s2021_s0 + $0x160] sm:$0xff]  ;;  %p1056_p4 = pnand %p1055_p3, %p1049_p0 }
  0x19   :  { %101 = vadd.xlane.f32.xlu0 %v100_v48  ;;  %v1378_v48 = vld [vmem:[%s2021_s0 + $0x168] sm:$0xff] }
  0x1a   :  { %105 = vadd.xlane.f32.xlu1 %v104_v49  ;;  %v140_v49 = vadd.f32 %v139_v41, %v1364_v40 }
  0x1d   :  { %109 = vadd.xlane.f32.xlu0 %v108_v56  ;;  %v147_v56 = vsel %vm58_vm0, %v1378_v48, 0.0 }
  0x1e   :  { %113 = vadd.xlane.f32.xlu1 %v112_v57  ;;  %v148_v57 = vadd.f32 %v147_v56, %v1385_v53 }
  0x21   :  { %117 = vadd.xlane.f32.xlu0 %v116_v3 }
  0x22   :  { %121 = vadd.xlane.f32.xlu1 %v120_v7 }
  0x25   :  { %125 = vadd.xlane.f32.xlu0 %v124_v19 }
  0x26   :  { %129 = vadd.xlane.f32.xlu1 %v128_v21 }
  0x29   :  { %133 = vadd.xlane.f32.xlu0 %v132_v35 }
  0x2a   :  { %137 = vadd.xlane.f32.xlu1 %v136_v37 }
  0x2d   :  { %141 = vadd.xlane.f32.xlu0 %v140_v49 }
  0x2e   :  { %145 = vadd.xlane.f32.xlu1 %v144_v51 }
  0x31   :  { %149 = vadd.xlane.f32.xlu0 %v148_v57 }
  0x92   :  { %v62_v59 = vpop.xlane.xlu0 %61 }
  0x93   :  { %v1390_v61 = vmul.f32 0.0051020407, %v62_v59  ;;  %v70_v3 = vpop.xlane.xlu1 %69 }
  0x94   :  { %v1392_v7 = vmul.f32 0.0051020407, %v70_v3 }
  0x95   :  { %v174_v9 = vsub.f32 %v1094_v0, %v1390_v61  ;;  %v175_v13 = vsub.f32 %v1099_v1, %v1390_v61 }
  0x96   :  { %v66_v19 = vpop.xlane.xlu0 %65  ;;  %v178_v21 = vsub.f32 %v1104_v2, %v1392_v7  ;;  %v179_v25 = vsub.f32 %v1111_v4, %v1392_v7 }
  0x97   :  { %v1402_v29 = vmul.f32 0.0051020407, %v66_v19  ;;  %v74_v35 = vpop.xlane.xlu1 %73  ;;  %v220_v37 = vmul.f32 %v174_v9, %v174_v9  ;;  %v221_v41 = vmul.f32 %v175_v13, %v175_v13 }
  0x98   :  { %v1404_v45 = vmul.f32 0.0051020407, %v74_v35  ;;  %v224_v49 = vmul.f32 %v178_v21, %v178_v21  ;;  %v225_v51 = vmul.f32 %v179_v25, %v179_v25 }
  0x99   :  { %v266_v0 = vsel %vm58_vm0, %v221_v41, 0.0  ;;  %v176_v1 = vsub.f32 %v1116_v5, %v1402_v29  ;;  %v177_v2 = vsub.f32 %v1121_v6, %v1402_v29 }
  0x9a   :  { %v78_v56 = vpop.xlane.xlu0 %77  ;;  %v267_v57 = vadd.f32 %v266_v0, %v220_v37  ;;  %v274_v4 = vsel %vm58_vm0, %v225_v51, 0.0  ;;  %v180_v59 = vsub.f32 %v1131_v10, %v1404_v45  ;;  %v181_v3 = vsub.f32 %v1136_v11, %v1404_v45 }
  0x9b   :  { %v1416_v9 = vmul.f32 0.0051020407, %v78_v56  ;;  %v82_v13 = vpop.xlane.xlu1 %81  ;;  %v222_v19 = vmul.f32 %v176_v1, %v176_v1  ;;  %v223_v21 = vmul.f32 %v177_v2, %v177_v2  ;;  %v275_v25 = vadd.f32 %v274_v4, %v224_v49 }
  0x9c   :  { %268 = vadd.xlane.f32.xlu1 %v267_v57  ;;  %v1418_v5 = vmul.f32 0.0051020407, %v82_v13  ;;  %v226_v6 = vmul.f32 %v180_v59, %v180_v59  ;;  %v227_v35 = vmul.f32 %v181_v3, %v181_v3 }
  0x9d   :  { %v270_v37 = vsel %vm58_vm0, %v223_v21, 0.0  ;;  %v182_v41 = vsub.f32 %v1156_v18, %v1416_v9  ;;  %v183_v10 = vsub.f32 %v1144_v14, %v1416_v9 }
  0x9e   :  { %v86_v11 = vpop.xlane.xlu0 %85  ;;  %v271_v51 = vadd.f32 %v270_v37, %v222_v19  ;;  %v278_v0 = vsel %vm58_vm0, %v227_v35, 0.0  ;;  %v184_v1 = vsub.f32 %v1163_v20, %v1418_v5  ;;  %v185_v49 = vsub.f32 %v1149_v15, %v1418_v5 }
  0x9f   :  { %v1430_v2 = vmul.f32 0.0051020407, %v86_v11  ;;  %v90_v56 = vpop.xlane.xlu1 %89  ;;  %v228_v57 = vmul.f32 %v182_v41, %v182_v41  ;;  %v229_v4 = vmul.f32 %v183_v10, %v183_v10  ;;  %v279_v14 = vadd.f32 %v278_v0, %v226_v6 }
  0xa0   :  { %276 = vadd.xlane.f32.xlu1 %v275_v25  ;;  %272 = vadd.xlane.f32.xlu0 %v271_v51  ;;  %v1432_v18 = vmul.f32 0.0051020407, %v90_v56  ;;  %v230_v59 = vmul.f32 %v184_v1, %v184_v1  ;;  %v231_v3 = vmul.f32 %v185_v49, %v185_v49 }
  0xa1   :  { %v282_v13 = vsel %vm58_vm0, %v229_v4, 0.0  ;;  %v186_v20 = vsub.f32 %v1182_v26, %v1430_v2  ;;  %v187_v15 = vsub.f32 %v1170_v22, %v1430_v2 }
  0xa2   :  { %v94_v19 = vpop.xlane.xlu0 %93  ;;  %v283_v21 = vadd.f32 %v282_v13, %v228_v57  ;;  %v286_v35 = vsel %vm58_vm0, %v231_v3, 0.0  ;;  %v188_v25 = vsub.f32 %v1189_v28, %v1432_v18  ;;  %v189_v6 = vsub.f32 %v1175_v23, %v1432_v18 }
  0xa3   :  { %v1444_v37 = vmul.f32 0.0051020407, %v94_v19  ;;  %v98_v41 = vpop.xlane.xlu1 %97  ;;  %v232_v10 = vmul.f32 %v186_v20, %v186_v20  ;;  %v233_v11 = vmul.f32 %v187_v15, %v187_v15  ;;  %v287_v22 = vadd.f32 %v286_v35, %v230_v59 }
  0xa4   :  { %280 = vadd.xlane.f32.xlu0 %v279_v14  ;;  %284 = vadd.xlane.f32.xlu1 %v283_v21  ;;  %v1446_v26 = vmul.f32 0.0051020407, %v98_v41  ;;  %v234_v51 = vmul.f32 %v188_v25, %v188_v25  ;;  %v235_v0 = vmul.f32 %v189_v6, %v189_v6 }
  0xa5   :  { %v290_v1 = vsel %vm58_vm0, %v233_v11, 0.0  ;;  %v190_v28 = vsub.f32 %v1208_v34, %v1444_v37  ;;  %v191_v23 = vsub.f32 %v1196_v30, %v1444_v37 }
  0xa6   :  { %v102_v49 = vpop.xlane.xlu0 %101  ;;  %v291_v56 = vadd.f32 %v290_v1, %v232_v10  ;;  %v294_v57 = vsel %vm58_vm0, %v235_v0, 0.0  ;;  %v192_v4 = vsub.f32 %v1215_v36, %v1446_v26  ;;  %v193_v14 = vsub.f32 %v1201_v31, %v1446_v26 }
  0xa7   :  { %v1458_v59 = vmul.f32 0.0051020407, %v102_v49  ;;  %v106_v3 = vpop.xlane.xlu1 %105  ;;  %v236_v13 = vmul.f32 %v190_v28, %v190_v28  ;;  %v237_v20 = vmul.f32 %v191_v23, %v191_v23  ;;  %v295_v30 = vadd.f32 %v294_v57, %v234_v51 }
  0xa8   :  { %288 = vadd.xlane.f32.xlu0 %v287_v22  ;;  %292 = vadd.xlane.f32.xlu1 %v291_v56  ;;  %v1460_v34 = vmul.f32 0.0051020407, %v106_v3  ;;  %v238_v15 = vmul.f32 %v192_v4, %v192_v4  ;;  %v239_v19 = vmul.f32 %v193_v14, %v193_v14 }
  0xa9   :  { %v298_v21 = vsel %vm58_vm0, %v237_v20, 0.0  ;;  %v194_v36 = vsub.f32 %v1234_v42, %v1458_v59  ;;  %v195_v31 = vsub.f32 %v1222_v38, %v1458_v59 }
  0xaa   :  { %v110_v35 = vpop.xlane.xlu0 %109  ;;  %v299_v25 = vadd.f32 %v298_v21, %v236_v13  ;;  %v302_v6 = vsel %vm58_vm0, %v239_v19, 0.0  ;;  %v196_v41 = vsub.f32 %v1241_v44, %v1460_v34  ;;  %v197_v10 = vsub.f32 %v1227_v39, %v1460_v34 }
  0xab   :  { %v1472_v11 = vmul.f32 0.0051020407, %v110_v35  ;;  %v114_v22 = vpop.xlane.xlu1 %113  ;;  %v240_v51 = vmul.f32 %v194_v36, %v194_v36  ;;  %v241_v0 = vmul.f32 %v195_v31, %v195_v31  ;;  %v303_v38 = vadd.f32 %v302_v6, %v238_v15 }
  0xac   :  { %296 = vadd.xlane.f32.xlu0 %v295_v30  ;;  %300 = vadd.xlane.f32.xlu1 %v299_v25  ;;  %v1474_v42 = vmul.f32 0.0051020407, %v114_v22  ;;  %v242_v1 = vmul.f32 %v196_v41, %v196_v41  ;;  %v243_v28 = vmul.f32 %v197_v10, %v197_v10 }
  0xad   :  { %v306_v23 = vsel %vm58_vm0, %v241_v0, 0.0  ;;  %v198_v44 = vsub.f32 %v1260_v50, %v1472_v11  ;;  %v199_v39 = vsub.f32 %v1248_v46, %v1472_v11 }
  0xae   :  { %v118_v49 = vpop.xlane.xlu0 %117  ;;  %v307_v56 = vadd.f32 %v306_v23, %v240_v51  ;;  %v310_v57 = vsel %vm58_vm0, %v243_v28, 0.0  ;;  %v200_v4 = vsub.f32 %v1267_v52, %v1474_v42  ;;  %v201_v14 = vsub.f32 %v1253_v47, %v1474_v42 }
  0xaf   :  { %v1486_v3 = vmul.f32 0.0051020407, %v118_v49  ;;  %v122_v13 = vpop.xlane.xlu1 %121  ;;  %v244_v20 = vmul.f32 %v198_v44, %v198_v44  ;;  %v245_v30 = vmul.f32 %v199_v39, %v199_v39  ;;  %v311_v46 = vadd.f32 %v310_v57, %v242_v1 }
  0xb0   :  { %304 = vadd.xlane.f32.xlu0 %v303_v38  ;;  %308 = vadd.xlane.f32.xlu1 %v307_v56  ;;  %v1488_v50 = vmul.f32 0.0051020407, %v122_v13  ;;  %v246_v15 = vmul.f32 %v200_v4, %v200_v4  ;;  %v247_v19 = vmul.f32 %v201_v14, %v201_v14 }
  0xb1   :  { %v314_v21 = vsel %vm58_vm0, %v245_v30, 0.0  ;;  %v202_v52 = vsub.f32 %v1286_v58, %v1486_v3  ;;  %v203_v47 = vsub.f32 %v1274_v54, %v1486_v3 }
  0xb2   :  { %v126_v36 = vpop.xlane.xlu0 %125  ;;  %v315_v31 = vadd.f32 %v314_v21, %v244_v20  ;;  %v318_v35 = vsel %vm58_vm0, %v247_v19, 0.0  ;;  %v204_v25 = vsub.f32 %v1293_v60, %v1488_v50  ;;  %v205_v6 = vsub.f32 %v1279_v55, %v1488_v50 }
  0xb3   :  { %v1500_v41 = vmul.f32 0.0051020407, %v126_v36  ;;  %v130_v10 = vpop.xlane.xlu1 %129  ;;  %v248_v22 = vmul.f32 %v202_v52, %v202_v52  ;;  %v249_v51 = vmul.f32 %v203_v47, %v203_v47  ;;  %v319_v54 = vadd.f32 %v318_v35, %v246_v15 }
  0xb4   :  { %312 = vadd.xlane.f32.xlu0 %v311_v46  ;;  %316 = vadd.xlane.f32.xlu1 %v315_v31  ;;  %v1502_v58 = vmul.f32 0.0051020407, %v130_v10  ;;  %v250_v0 = vmul.f32 %v204_v25, %v204_v25  ;;  %v251_v38 = vmul.f32 %v205_v6, %v205_v6 }
  0xb5   :  { %v322_v1 = vsel %vm58_vm0, %v249_v51, 0.0  ;;  %v206_v60 = vsub.f32 %v1312_v8, %v1500_v41  ;;  %v207_v55 = vsub.f32 %v1300_v62, %v1500_v41 }
  0xb6   :  { %v134_v28 = vpop.xlane.xlu0 %133  ;;  %v323_v23 = vadd.f32 %v322_v1, %v248_v22  ;;  %v326_v44 = vsel %vm58_vm0, %v251_v38, 0.0  ;;  %v208_v39 = vsub.f32 %v1319_v12, %v1502_v58  ;;  %v209_v49 = vsub.f32 %v1305_v63, %v1502_v58 }
  0xb7   :  { %v1514_v56 = vmul.f32 0.0051020407, %v134_v28  ;;  %v138_v57 = vpop.xlane.xlu1 %137  ;;  %v252_v4 = vmul.f32 %v206_v60, %v206_v60  ;;  %v253_v14 = vmul.f32 %v207_v55, %v207_v55  ;;  %v327_v62 = vadd.f32 %v326_v44, %v250_v0 }
  0xb8   :  { %320 = vadd.xlane.f32.xlu0 %v319_v54  ;;  %324 = vadd.xlane.f32.xlu1 %v323_v23  ;;  %v1516_v8 = vmul.f32 0.0051020407, %v138_v57  ;;  %v254_v13 = vmul.f32 %v208_v39, %v208_v39  ;;  %v255_v20 = vmul.f32 %v209_v49, %v209_v49  ;;  %v1072_v22 = vmov 0  }
  0xb9   :  { %v330_v30 = vsel %vm58_vm0, %v253_v14, 0.0  ;;  %v210_v12 = vsub.f32 %v1338_v24, %v1514_v56  ;;  %v211_v63 = vsub.f32 %v1326_v16, %v1514_v56  ;;  %954 = vset.pattern.permute.xlu0 %v1072_v22  ;;  %955 = vset.pattern.permute.xlu1 %v1072_v22 }
  0xba   :  { %v142_v46 = vpop.xlane.xlu0 %141  ;;  %v331_v15 = vadd.f32 %v330_v30, %v252_v4  ;;  %v334_v19 = vsel %vm58_vm0, %v255_v20, 0.0  ;;  %v212_v21 = vsub.f32 %v1345_v27, %v1516_v8  ;;  %v213_v52 = vsub.f32 %v1331_v17, %v1516_v8 }
  0xbb   :  { %v1528_v47 = vmul.f32 0.0051020407, %v142_v46  ;;  %v146_v36 = vpop.xlane.xlu1 %145  ;;  %v335_v31 = vadd.f32 %v334_v19, %v254_v13  ;;  %v256_v35 = vmul.f32 %v210_v12, %v210_v12  ;;  %v257_v25 = vmul.f32 %v211_v63, %v211_v63 }
  0xbc   :  { %328 = vadd.xlane.f32.xlu0 %v327_v62  ;;  %332 = vadd.xlane.f32.xlu1 %v331_v15  ;;  %v1530_v24 = vmul.f32 0.0051020407, %v146_v36  ;;  %v258_v16 = vmul.f32 %v212_v21, %v212_v21  ;;  %v259_v6 = vmul.f32 %v213_v52, %v213_v52 }
  0xbd   :  { %v338_v10 = vsel %vm58_vm0, %v257_v25, 0.0  ;;  %v214_v27 = vsub.f32 %v1364_v40, %v1528_v47  ;;  %v215_v17 = vsub.f32 %v1352_v32, %v1528_v47 }
  0xbe   :  { %v150_v51 = vpop.xlane.xlu0 %149  ;;  %v339_v54 = vadd.f32 %v338_v10, %v256_v35  ;;  %v342_v0 = vsel %vm58_vm0, %v259_v6, 0.0  ;;  %v216_v38 = vsub.f32 %v1371_v43, %v1530_v24  ;;  %v217_v1 = vsub.f32 %v1357_v33, %v1530_v24  ;;  %v427_v6 = vld [vmem:[%s2022_s1] sm:$0xff] }
  0xbf   :  { %v1542_v60 = vmul.f32 0.0051020407, %v150_v51  ;;  %v260_v55 = vmul.f32 %v214_v27, %v214_v27  ;;  %v261_v40 = vmul.f32 %v215_v17, %v215_v17  ;;  %v343_v32 = vadd.f32 %v342_v0, %v258_v16  ;;  %v428_v0 = vld [vmem:[%s2022_s1 + $0x8] sm:$0xff] }
  0xc0   :  { %336 = vadd.xlane.f32.xlu0 %v335_v31  ;;  %340 = vadd.xlane.f32.xlu1 %v339_v54  ;;  %v262_v28 = vmul.f32 %v216_v38, %v216_v38  ;;  %v263_v23 = vmul.f32 %v217_v1, %v217_v1 }
  0xc1   :  { %v346_v44 = vsel %vm58_vm0, %v261_v40, 0.0  ;;  %v218_v39 = vsub.f32 %v1385_v53, %v1542_v60  ;;  %v219_v43 = vsub.f32 %v1378_v48, %v1542_v60 }
  0xc2   :  { %v347_v49 = vadd.f32 %v346_v44, %v260_v55  ;;  %v350_v33 = vsel %vm58_vm0, %v263_v23, 0.0 }
  0xc3   :  { %v264_v57 = vmul.f32 %v218_v39, %v218_v39  ;;  %v265_v4 = vmul.f32 %v219_v43, %v219_v43  ;;  %v351_v14 = vadd.f32 %v350_v33, %v262_v28  ;;  %v429_v39 = vld [vmem:[%s2022_s1 + $0x10] sm:$0xff] }
  0xc4   :  { %344 = vadd.xlane.f32.xlu0 %v343_v32  ;;  %348 = vadd.xlane.f32.xlu1 %v347_v49 }
  0xc5   :  { %v354_v62 = vsel %vm58_vm0, %v265_v4, 0.0 }
  0xc6   :  { %v355_v13 = vadd.f32 %v354_v62, %v264_v57 }
  0xc8   :  { %352 = vadd.xlane.f32.xlu0 %v351_v14  ;;  %356 = vadd.xlane.f32.xlu1 %v355_v13 }
 0x129   :  { %v269_v20 = vpop.xlane.xlu1 %268 }
 0x12a   :  { %v358_v30 = vmul.f32 0.0051020407, %v269_v20  ;;  %v430_v20 = vld [vmem:[%s2022_s1 + $0x18] sm:$0xff] }
 0x12c   :  { %v381_v12 = vadd.f32 0.001, %v358_v30 }
 0x12d   :  { %v277_v53 = vpop.xlane.xlu1 %276  ;;  %v273_v63 = vpop.xlane.xlu0 %272 }
 0x12e   :  { %956 = vrsqrt.f32 %v381_v12  ;;  %v360_v48 = vmul.f32 0.0051020407, %v277_v53  ;;  %v359_v46 = vmul.f32 0.0051020407, %v273_v63 }
 0x130   :  { %v382_v15 = vadd.f32 0.001, %v359_v46  ;;  %v383_v19 = vadd.f32 0.001, %v360_v48 }
 0x131   :  { %v285_v21 = vpop.xlane.xlu1 %284  ;;  %v281_v52 = vpop.xlane.xlu0 %280 }
 0x132   :  { %v361_v36 = vmul.f32 0.0051020407, %v281_v52  ;;  %958 = vrsqrt.f32 %v382_v15  ;;  %v362_v31 = vmul.f32 0.0051020407, %v285_v21  ;;  %v431_v21 = vld [vmem:[%s2022_s1 + $0x20] sm:$0xff] }
 0x133   :  { %960 = vrsqrt.f32 %v383_v19 }
 0x134   :  { %v384_v35 = vadd.f32 0.001, %v361_v36  ;;  %v385_v27 = vadd.f32 0.001, %v362_v31 }
 0x135   :  { %v293_v25 = vpop.xlane.xlu1 %292  ;;  %v289_v16 = vpop.xlane.xlu0 %288 }
 0x136   :  { %962 = vrsqrt.f32 %v384_v35  ;;  %v363_v17 = vmul.f32 0.0051020407, %v289_v16  ;;  %v364_v1 = vmul.f32 0.0051020407, %v293_v25 }
 0x137   :  { %964 = vrsqrt.f32 %v385_v27  ;;  %v436_v27 = vld [vmem:[%s2022_s1 + $0x48] sm:$0xff] }
 0x138   :  { %v957_v10 = vpop.eup %956  ;;  %v386_v55 = vadd.f32 0.001, %v363_v17  ;;  %v387_v49 = vadd.f32 0.001, %v364_v1 }
 0x139   :  { %v301_v22 = vpop.xlane.xlu1 %300  ;;  %v297_v51 = vpop.xlane.xlu0 %296  ;;  %v1554_v54 = vmul.f32 %v957_v10, %v427_v6  ;;  %v432_v10 = vld [vmem:[%s2022_s1 + $0x28] sm:$0xff] }
 0x13a   :  { %966 = vrsqrt.f32 %v386_v55  ;;  %v365_v33 = vmul.f32 0.0051020407, %v297_v51  ;;  %v366_v12 = vmul.f32 0.0051020407, %v301_v22 }
 0x13b   :  { %545 = vperm.xlu0 %954, %v1554_v54  }
 0x13c   :  { %v959_v38 = vpop.eup %958  ;;  %v388_v53 = vadd.f32 0.001, %v365_v33  ;;  %v389_v36 = vadd.f32 0.001, %v366_v12 }
 0x13d   :  { %v309_v40 = vpop.xlane.xlu1 %308  ;;  %v305_v32 = vpop.xlane.xlu0 %304  ;;  %v1560_v23 = vmul.f32 %v959_v38, %v428_v0 }
 0x13e   :  { %v367_v28 = vmul.f32 0.0051020407, %v305_v32  ;;  %v961_v44 = vpop.eup %960  ;;  %v368_v31 = vmul.f32 0.0051020407, %v309_v40 }
 0x13f   :  { %550 = vperm.xlu1 %955, %v1560_v23   ;;  %v1566_v62 = vmul.f32 %v961_v44, %v429_v39  ;;  %v433_v44 = vld [vmem:[%s2022_s1 + $0x30] sm:$0xff]  ;;  %v438_v39 = vld [vmem:[%s2022_s1 + $0x58] sm:$0xff] }
 0x140   :  { %v390_v43 = vadd.f32 0.001, %v367_v28  ;;  %v963_v13 = vpop.eup %962  ;;  %v391_v0 = vadd.f32 0.001, %v368_v31 }
 0x141   :  { %v317_v57 = vpop.xlane.xlu1 %316  ;;  %v313_v4 = vpop.xlane.xlu0 %312  ;;  %v1572_v15 = vmul.f32 %v963_v13, %v430_v20 }
 0x142   :  { %v369_v14 = vmul.f32 0.0051020407, %v313_v4  ;;  %968 = vrsqrt.f32 %v390_v43  ;;  %v965_v19 = vpop.eup %964  ;;  %v370_v38 = vmul.f32 0.0051020407, %v317_v57 }
 0x143   :  { %555 = vperm.xlu1 %955, %v1566_v62   ;;  %970 = vrsqrt.f32 %v387_v49  ;;  %v1578_v16 = vmul.f32 %v965_v19, %v431_v21 }
 0x144   :  { %v392_v30 = vadd.f32 0.001, %v369_v14  ;;  %v967_v6 = vpop.eup %966  ;;  %v393_v33 = vadd.f32 0.001, %v370_v38 }
 0x145   :  { %v321_v63 = vpop.xlane.xlu0 %320  ;;  %v325_v48 = vpop.xlane.xlu1 %324  ;;  %v1587_v40 = vmul.f32 %v967_v6, %v432_v10  ;;  %v435_v6 = vld [vmem:[%s2022_s1 + $0x40] sm:$0xff]  ;;  %v442_v10 = vld [vmem:[%s2022_s1 + $0x78] sm:$0xff] }
 0x146   :  { %v371_v46 = vmul.f32 0.0051020407, %v321_v63  ;;  %972 = vrsqrt.f32 %v392_v30  ;;  %v372_v57 = vmul.f32 0.0051020407, %v325_v48  ;;  %v440_v63 = vld [vmem:[%s2022_s1 + $0x68] sm:$0xff] }
 0x147   :  { %560 = vperm.xlu1 %955, %v1572_v15   ;;  %974 = vrsqrt.f32 %v388_v53  ;;  %v434_v53 = vld [vmem:[%s2022_s1 + $0x38] sm:$0xff] }
 0x148   :  { %v394_v52 = vadd.f32 0.001, %v371_v46  ;;  %v395_v19 = vadd.f32 0.001, %v372_v57 }
 0x149   :  { %v329_v35 = vpop.xlane.xlu0 %328  ;;  %v333_v17 = vpop.xlane.xlu1 %332 }
 0x14a   :  { %v373_v25 = vmul.f32 0.0051020407, %v329_v35  ;;  %976 = vrsqrt.f32 %v394_v52  ;;  %v374_v21 = vmul.f32 0.0051020407, %v333_v17 }
 0x14b   :  { %565 = vperm.xlu1 %955, %v1578_v16   ;;  %978 = vrsqrt.f32 %v389_v36 }
 0x14c   :  { %v396_v22 = vadd.f32 0.001, %v373_v25  ;;  %v969_v51 = vpop.eup %968 }
 0x14d   :  { %v337_v1 = vpop.xlane.xlu0 %336  ;;  %v1589_v32 = vmul.f32 %v969_v51, %v436_v27  ;;  %v971_v28 = vpop.eup %970  ;;  %v397_v51 = vadd.f32 0.001, %v374_v21 }
 0x14e   :  { %v375_v55 = vmul.f32 0.0051020407, %v337_v1  ;;  %980 = vrsqrt.f32 %v396_v22  ;;  %v341_v14 = vpop.xlane.xlu1 %340  ;;  %v1599_v20 = vmul.f32 %v971_v28, %v433_v44  ;;  %v437_v28 = vld [vmem:[%s2022_s1 + $0x50] sm:$0xff]  ;;  %v444_v44 = vld [vmem:[%s2022_s1 + $0x88] sm:$0xff] }
 0x14f   :  { %570 = vperm.xlu1 %955, %v1587_v40   ;;  %590 = vperm.xlu0 %954, %v1589_v32   ;;  %982 = vrsqrt.f32 %v391_v0  ;;  %v376_v0 = vmul.f32 0.0051020407, %v341_v14 }
 0x150   :  { %v398_v43 = vadd.f32 0.001, %v375_v55  ;;  %v973_v49 = vpop.eup %972 }
 0x151   :  { %v345_v4 = vpop.xlane.xlu0 %344  ;;  %v1601_v30 = vmul.f32 %v973_v49, %v438_v39  ;;  %v975_v12 = vpop.eup %974 }
 0x152   :  { %v377_v13 = vmul.f32 0.0051020407, %v345_v4  ;;  %984 = vrsqrt.f32 %v398_v43  ;;  %v1611_v31 = vmul.f32 %v975_v12, %v434_v53  ;;  %v349_v27 = vpop.xlane.xlu1 %348  ;;  %v399_v43 = vadd.f32 0.001, %v376_v0  ;;  %v446_v12 = vld [vmem:[%s2022_s1 + $0x98] sm:$0xff] }
 0x153   :  { %575 = vperm.xlu1 %955, %v1599_v20   ;;  %600 = vperm.xlu0 %954, %v1601_v30   ;;  %986 = vrsqrt.f32 %v393_v33  ;;  %v378_v49 = vmul.f32 0.0051020407, %v349_v27  ;;  %v927_v0 = vld [vmem:[%s2022_s1 + $0xb8] sm:$0xff] }
 0x154   :  { %v400_v46 = vadd.f32 0.001, %v377_v13  ;;  %v977_v48 = vpop.eup %976  ;;  %v439_v13 = vld [vmem:[%s2022_s1 + $0x60] sm:$0xff] }
 0x155   :  { %v353_v52 = vpop.xlane.xlu0 %352  ;;  %v1613_v35 = vmul.f32 %v977_v48, %v440_v63  ;;  %v979_v25 = vpop.eup %978  ;;  %v401_v63 = vadd.f32 0.001, %v378_v49 }
 0x156   :  { %v379_v36 = vmul.f32 0.0051020407, %v353_v52  ;;  %988 = vrsqrt.f32 %v400_v46  ;;  %v1623_v38 = vmul.f32 %v979_v25, %v435_v6  ;;  %v357_v33 = vpop.xlane.xlu1 %356  ;;  %v441_v52 = vld [vmem:[%s2022_s1 + $0x70] sm:$0xff] }
 0x157   :  { %580 = vperm.xlu1 %955, %v1611_v31   ;;  %610 = vperm.xlu0 %954, %v1613_v35   ;;  %990 = vrsqrt.f32 %v395_v19  ;;  %v380_v46 = vmul.f32 0.0051020407, %v357_v33  ;;  %v501_v33 = vmul.f32 %v1578_v16, %v1416_v9  ;;  %v449_v9 = vld [vmem:[%s2022_s1 + $0xb0] sm:$0xff]  ;;  %v933_v16 = vld [vmem:[%s2022_s1 + $0xe8] sm:$0xff] }
 0x158   :  { %v402_v22 = vadd.f32 0.001, %v379_v36  ;;  %v981_v17 = vpop.eup %980  ;;  %v448_v36 = vld [vmem:[%s2022_s1 + $0xa8] sm:$0xff] }
 0x159   :  { %v1625_v1 = vmul.f32 %v981_v17, %v442_v10  ;;  %v983_v55 = vpop.eup %982  ;;  %v403_v6 = vadd.f32 0.001, %v380_v46 }
 0x15a   :  { %992 = vrsqrt.f32 %v402_v22  ;;  %v1635_v57 = vmul.f32 %v983_v55, %v437_v28  ;;  %v497_v22 = vmul.f32 %v1554_v54, %v1390_v61  ;;  %v445_v61 = vld [vmem:[%s2022_s1 + $0x90] sm:$0xff]  ;;  %v929_v54 = vld [vmem:[%s2022_s1 + $0xc8] sm:$0xff] }
 0x15b   :  { %585 = vperm.xlu1 %955, %v1623_v38   ;;  %620 = vperm.xlu0 %954, %v1625_v1   ;;  %994 = vrsqrt.f32 %v397_v51  ;;  %v443_v51 = vld [vmem:[%s2022_s1 + $0x80] sm:$0xff] }
 0x15c   :  { %v985_v39 = vpop.eup %984  ;;  %996 = vrsqrt.f32 %v399_v43  ;;  %v520_v28 = vsub.f32 %v927_v0, %v497_v22  ;;  %v500_v22 = vmul.f32 %v1572_v15, %v1404_v45  ;;  %v939_v15 = vld [vmem:[%s2022_s1 + $0x118] sm:$0xff] }
 0x15d   :  { %v1637_v4 = vmul.f32 %v985_v39, %v444_v44  ;;  %v987_v14 = vpop.eup %986  ;;  %998 = vrsqrt.f32 %v401_v63  ;;  %v499_v44 = vmul.f32 %v1566_v62, %v1392_v7  ;;  %v447_v7 = vld [vmem:[%s2022_s1 + $0xa0] sm:$0xff]  ;;  %v931_v62 = vld [vmem:[%s2022_s1 + $0xd8] sm:$0xff] }
 0x15e   :  { %v486_v48 = vmul.f32 %v987_v14, %v439_v13  ;;  %1000 = vrsqrt.f32 %v403_v6 }
 0x15f   :  { %595 = vperm.xlu1 %955, %v1635_v57   ;;  %630 = vperm.xlu0 %954, %v1637_v4   ;;  %v522_v49 = vsub.f32 %v929_v54, %v499_v44  ;;  %v508_v54 = vmul.f32 %v1601_v30, %v1460_v34  ;;  %v940_v34 = vld [vmem:[%s2022_s1 + $0x120] sm:$0xff] }
 0x160   :  { %v989_v53 = vpop.eup %988  ;;  %v509_v45 = vmul.f32 %v486_v48, %v1472_v11  ;;  %v941_v11 = vld [vmem:[%s2022_s1 + $0x128] sm:$0xff] }
 0x161   :  { %v1647_v19 = vmul.f32 %v989_v53, %v446_v12  ;;  %v991_v21 = vpop.eup %990  ;;  %v524_v12 = vsub.f32 %v931_v62, %v501_v33  ;;  %v503_v53 = vmul.f32 %v1599_v20, %v1430_v2  ;;  %v928_v2 = vld [vmem:[%s2022_s1 + $0xc0] sm:$0xff]  ;;  %v935_v20 = vld [vmem:[%s2022_s1 + $0xf8] sm:$0xff]  ;;  %v510_v33 = vmul.f32 %v1613_v35, %v1474_v42  ;;  %v942_v42 = vld [vmem:[%s2022_s1 + $0x130] sm:$0xff] }
 0x162   :  { %v488_v10 = vmul.f32 %v991_v21, %v441_v52  ;;  %v498_v52 = vmul.f32 %v1560_v23, %v1402_v29  ;;  %v507_v29 = vmul.f32 %v1635_v57, %v1458_v59  ;;  %v937_v23 = vld [vmem:[%s2022_s1 + $0x108] sm:$0xff]  ;;  %v932_v59 = vld [vmem:[%s2022_s1 + $0xe0] sm:$0xff]  ;;  %v532_v0 = vsub.f32 %v939_v15, %v509_v45 }
 0x163   :  { %605 = vperm.xlu1 %955, %v486_v48   ;;  %640 = vperm.xlu0 %954, %v1647_v19   ;;  %v526_v21 = vsub.f32 %v933_v16, %v503_v53  ;;  %v533_v30 = vsub.f32 %v940_v34, %v510_v33  ;;  %v946_v53 = vld [vmem:[%s2022_s1 + $0x150] sm:$0xff]  ;;  %v1008_v33 = vld [vmem:[%s2021_s0 + $0x60] sm:$0xff]  ;;  %v1009_v34 = vld [vmem:[%s2021_s0 + $0x68] sm:$0xff] }
 0x164   :  { %v993_v25 = vpop.eup %992  ;;  %v511_v44 = vmul.f32 %v488_v10, %v1486_v3  ;;  %v943_v3 = vld [vmem:[%s2022_s1 + $0x138] sm:$0xff] }
 0x165   :  { %v1656_v27 = vmul.f32 %v993_v25, %v448_v36  ;;  %v995_v17 = vpop.eup %994  ;;  %v505_v36 = vmul.f32 %v1623_v38, %v1444_v37  ;;  %v521_v25 = vsub.f32 %v928_v2, %v498_v52  ;;  %v930_v37 = vld [vmem:[%s2022_s1 + $0xd0] sm:$0xff] }
 0x166   :  { %v490_v55 = vmul.f32 %v995_v17, %v443_v51  ;;  %v997_v39 = vpop.eup %996  ;;  %v523_v38 = vsub.f32 %v930_v37, %v500_v22  ;;  %v530_v17 = vsub.f32 %v937_v23, %v507_v29  ;;  %v502_v51 = vmul.f32 %v1587_v40, %v1418_v5  ;;  %v934_v5 = vld [vmem:[%s2022_s1 + $0xf0] sm:$0xff] }
 0x167   :  { %615 = vperm.xlu1 %955, %v488_v10   ;;  %650 = vperm.xlu0 %954, %v1656_v27   ;;  %v492_v43 = vmul.f32 %v997_v39, %v445_v61  ;;  %v999_v14 = vpop.eup %998  ;;  %v528_v6 = vsub.f32 %v935_v20, %v505_v36  ;;  %v534_v48 = vsub.f32 %v941_v11, %v511_v44 }
 0x168   :  { %v494_v13 = vmul.f32 %v999_v14, %v447_v7  ;;  %v1001_v63 = vpop.eup %1000  ;;  %v525_v57 = vsub.f32 %v932_v59, %v502_v51  ;;  %v506_v39 = vmul.f32 %v1589_v32, %v1446_v26  ;;  %v513_v61 = vmul.f32 %v490_v55, %v1500_v41  ;;  %v938_v26 = vld [vmem:[%s2022_s1 + $0x110] sm:$0xff]  ;;  %v945_v41 = vld [vmem:[%s2022_s1 + $0x148] sm:$0xff]  ;;  %v1002_v51 = vld [vmem:[%s2021_s0] sm:$0xff] }
 0x169   :  { %v496_v46 = vmul.f32 %v1001_v63, %v449_v9  ;;  %v531_v32 = vsub.f32 %v938_v26, %v508_v54  ;;  %v512_v7 = vmul.f32 %v1625_v1, %v1488_v50  ;;  %v944_v50 = vld [vmem:[%s2022_s1 + $0x140] sm:$0xff]  ;;  %v516_v1 = vmul.f32 %v1647_v19, %v1516_v8  ;;  %v1003_v59 = vld [vmem:[%s2021_s0 + $0x8] sm:$0xff] }
 0x16a   :  { %v536_v10 = vsub.f32 %v943_v3, %v513_v61  ;;  %v517_v14 = vmul.f32 %v494_v13, %v1528_v47  ;;  %v949_v47 = vld [vmem:[%s2022_s1 + $0x168] sm:$0xff]  ;;  %v518_v9 = vmul.f32 %v1656_v27, %v1530_v24 }
 0x16b   :  { %625 = vperm.xlu1 %955, %v490_v55   ;;  %706 = vperm.xlu0 %954, %v520_v28   ;;  %v504_v28 = vmul.f32 %v1611_v31, %v1432_v18  ;;  %v936_v18 = vld [vmem:[%s2022_s1 + $0x100] sm:$0xff]  ;;  %v519_v62 = vmul.f32 %v496_v46, %v1542_v60  ;;  %v535_v35 = vsub.f32 %v942_v42, %v512_v7  ;;  %v1007_v54 = vld [vmem:[%s2021_s0 + $0x48] sm:$0xff]  ;;  %v1010_v42 = vld [vmem:[%s2021_s0 + $0x10] sm:$0xff] }
 0x16c   :  { %v529_v31 = vsub.f32 %v936_v18, %v506_v39  ;;  %v539_v63 = vsub.f32 %v946_v53, %v516_v1 }
 0x16d   :  { %v527_v40 = vsub.f32 %v934_v5, %v504_v28  ;;  %v1004_v5 = vld [vmem:[%s2021_s0 + $0x20] sm:$0xff] }
 0x16f   :  { %635 = vperm.xlu1 %955, %v492_v43   ;;  %716 = vperm.xlu0 %954, %v522_v49   ;;  %v515_v49 = vmul.f32 %v492_v43, %v1514_v56  ;;  %v947_v56 = vld [vmem:[%s2022_s1 + $0x158] sm:$0xff] }
 0x170   :  { %v540_v43 = vsub.f32 %v947_v56, %v517_v14 }
 0x171   :  { %v538_v55 = vsub.f32 %v945_v41, %v515_v49 }
 0x173   :  { %645 = vperm.xlu1 %955, %v494_v13   ;;  %726 = vperm.xlu0 %954, %v524_v12   ;;  %v542_v13 = vsub.f32 %v949_v47, %v519_v62  ;;  %v514_v12 = vmul.f32 %v1637_v4, %v1502_v58  ;;  %v948_v58 = vld [vmem:[%s2022_s1 + $0x160] sm:$0xff] }
 0x174   :  { %v541_v4 = vsub.f32 %v948_v58, %v518_v9 }
 0x175   :  { %v537_v60 = vsub.f32 %v944_v50, %v514_v12  ;;  %v1012_v12 = vld [vmem:[%s2021_s0 + $0x80] sm:$0xff] }
 0x177   :  { %655 = vperm.xlu1 %955, %v496_v46   ;;  %736 = vperm.xlu0 %954, %v526_v21  }
 0x17b   :  { %711 = vperm.xlu1 %955, %v521_v25   ;;  %746 = vperm.xlu0 %954, %v528_v6  }
 0x17f   :  { %721 = vperm.xlu1 %955, %v523_v38   ;;  %756 = vperm.xlu0 %954, %v530_v17  }
 0x183   :  { %731 = vperm.xlu1 %955, %v525_v57   ;;  %766 = vperm.xlu0 %954, %v532_v0  }
 0x187   :  { %741 = vperm.xlu1 %955, %v527_v40   ;;  %776 = vperm.xlu0 %954, %v534_v48   ;;  %v1005_v40 = vld [vmem:[%s2021_s0 + $0x28] sm:$0xff] }
 0x18b   :  { %751 = vperm.xlu1 %955, %v529_v31   ;;  %786 = vperm.xlu0 %954, %v536_v10   ;;  %v1006_v31 = vld [vmem:[%s2021_s0 + $0x40] sm:$0xff] }
 0x18f   :  { %761 = vperm.xlu1 %955, %v531_v32   ;;  %796 = vperm.xlu0 %954, %v538_v55  }
 0x193   :  { %771 = vperm.xlu1 %955, %v533_v30   ;;  %806 = vperm.xlu0 %954, %v540_v43  }
 0x197   :  { %781 = vperm.xlu1 %955, %v535_v35   ;;  %816 = vperm.xlu0 %954, %v542_v13   ;;  %v1011_v35 = vld [vmem:[%s2021_s0 + $0x18] sm:$0xff] }
 0x19b   :  { %791 = vperm.xlu1 %955, %v537_v60   ;;  %v1013_v60 = vld [vmem:[%s2021_s0 + $0x88] sm:$0xff] }
 0x19f   :  { %801 = vperm.xlu1 %955, %v539_v63  }
 0x1a3   :  { %811 = vperm.xlu1 %955, %v541_v4  }
 0x1ba   :  { %v546_v8 = vpop.permute.xlu0 %545 }
 0x1bb   :  { %v658_v45 = vmul.f32 %v1002_v51, %v546_v8  ;;  %v659_v15 = vmul.f32 %v1003_v59, %v546_v8 }
 0x1be   :  { %v551_v16 = vpop.permute.xlu1 %550 }
 0x1bf   :  { %v660_v47 = vmul.f32 %v1010_v42, %v551_v16  ;;  %v661_v13 = vmul.f32 %v1011_v35, %v551_v16  ;;  %v1014_v16 = vld [vmem:[%s2021_s0 + $0x30] sm:$0xff] }
 0x1c2   :  { %v556_v46 = vpop.permute.xlu1 %555 }
 0x1c3   :  { %v662_v11 = vmul.f32 %v1004_v5, %v556_v46  ;;  %v663_v48 = vmul.f32 %v1005_v40, %v556_v46 }
 0x1c6   :  { %v1780_v21 = vpop.permute.xlu1 %560 }
 0x1c7   :  { %v664_v8 = vmul.f32 %v1014_v16, %v1780_v21 }
 0x1ca   :  { %v566_v19 = vpop.permute.xlu1 %565 }
 0x1cb   :  { %v666_v10 = vmul.f32 %v1006_v31, %v566_v19  ;;  %v667_v49 = vmul.f32 %v1007_v54, %v566_v19  ;;  %v1015_v19 = vld [vmem:[%s2021_s0 + $0x38] sm:$0xff] }
 0x1ce   :  { %v1782_v52 = vpop.permute.xlu1 %570  ;;  %v1784_v36 = vpop.permute.xlu0 %590 }
 0x1d2   :  { %v576_v2 = vpop.permute.xlu1 %575  ;;  %v1786_v20 = vpop.permute.xlu0 %600 }
 0x1d3   :  { %v670_v14 = vmul.f32 %v1008_v33, %v576_v2  ;;  %v671_v56 = vmul.f32 %v1009_v34, %v576_v2  ;;  %v665_v2 = vmul.f32 %v1015_v19, %v1780_v21  ;;  %v1024_v34 = vld [vmem:[%s2021_s0 + $0xe0] sm:$0xff]  ;;  %v1030_v19 = vld [vmem:[%s2021_s0 + $0xb0] sm:$0xff] }
 0x1d6   :  { %v1788_v24 = vpop.permute.xlu1 %580  ;;  %v1790_v27 = vpop.permute.xlu0 %610 }
 0x1da   :  { %v586_v25 = vpop.permute.xlu1 %585  ;;  %v1792_v6 = vpop.permute.xlu0 %620 }
 0x1db   :  { %v674_v50 = vmul.f32 %v1012_v12, %v586_v25  ;;  %v675_v1 = vmul.f32 %v1013_v60, %v586_v25  ;;  %v1016_v25 = vld [vmem:[%s2021_s0 + $0xa0] sm:$0xff]  ;;  %v1026_v12 = vld [vmem:[%s2021_s0 + $0x90] sm:$0xff] }
 0x1de   :  { %v1794_v22 = vpop.permute.xlu1 %595  ;;  %v1796_v29 = vpop.permute.xlu0 %630 }
 0x1df   :  { %v678_v51 = vmul.f32 %v1016_v25, %v1794_v22 }
 0x1e2   :  { %v1798_v37 = vpop.permute.xlu1 %605  ;;  %v1800_v23 = vpop.permute.xlu0 %640 }
 0x1e6   :  { %v1802_v38 = vpop.permute.xlu1 %615  ;;  %v1804_v17 = vpop.permute.xlu0 %650 }
 0x1ea   :  { %v1812_v57 = vpop.permute.xlu1 %625  ;;  %v707_v0 = vpop.permute.xlu0 %706 }
 0x1eb   :  { %v819_v28 = vadd.f32 %v707_v0, %v658_v45  ;;  %v820_v44 = vadd.f32 %v707_v0, %v659_v15  ;;  %v1017_v45 = vld [vmem:[%s2021_s0 + $0xa8] sm:$0xff] }
 0x1ec   :  { %v679_v59 = vmul.f32 %v1017_v45, %v1794_v22  ;;  %v1019_v22 = vld [vmem:[%s2021_s0 + $0x58] sm:$0xff] }
 0x1ed   :  { %865 = vst [vmem:[#allocation2] sm:$0xff] %v819_v28  ;;  %866 = vst.msk [vmem:[#allocation2 + $0x8] sm:$0xff] %vm58_vm0, %v820_v44 }
 0x1ee   :  { %v1821_v39 = vpop.permute.xlu1 %635  ;;  %v717_v61 = vpop.permute.xlu0 %716 }
 0x1ef   :  { %v823_v18 = vadd.f32 %v717_v61, %v662_v11  ;;  %v824_v3 = vadd.f32 %v717_v61, %v663_v48  ;;  %v1018_v11 = vld [vmem:[%s2021_s0 + $0x50] sm:$0xff]  ;;  %v669_v48 = vmul.f32 %v1019_v22, %v1782_v52  ;;  %v1020_v61 = vld [vmem:[%s2021_s0 + $0xc0] sm:$0xff] }
 0x1f0   :  { %v668_v40 = vmul.f32 %v1018_v11, %v1782_v52  ;;  %v1034_v11 = vld [vmem:[%s2021_s0 + $0xd0] sm:$0xff] }
 0x1f1   :  { %869 = vst [vmem:[#allocation2 + $0x20] sm:$0xff] %v823_v18  ;;  %870 = vst.msk [vmem:[#allocation2 + $0x28] sm:$0xff] %vm58_vm0, %v824_v3  ;;  %v682_v18 = vmul.f32 %v1020_v61, %v1798_v37  ;;  %v1021_v3 = vld [vmem:[%s2021_s0 + $0xc8] sm:$0xff] }
 0x1f2   :  { %v1830_v26 = vpop.permute.xlu1 %645  ;;  %v727_v41 = vpop.permute.xlu0 %726  ;;  %v683_v31 = vmul.f32 %v1021_v3, %v1798_v37  ;;  %v1023_v37 = vld [vmem:[%s2021_s0 + $0x78] sm:$0xff] }
 0x1f3   :  { %v827_v32 = vadd.f32 %v727_v41, %v666_v10  ;;  %v828_v55 = vadd.f32 %v727_v41, %v667_v49 }
 0x1f5   :  { %873 = vst [vmem:[#allocation2 + $0x40] sm:$0xff] %v827_v32  ;;  %874 = vst.msk [vmem:[#allocation2 + $0x48] sm:$0xff] %vm58_vm0, %v828_v55  ;;  %v1022_v55 = vld [vmem:[%s2021_s0 + $0x70] sm:$0xff] }
 0x1f6   :  { %v1839_v30 = vpop.permute.xlu1 %655  ;;  %v737_v43 = vpop.permute.xlu0 %736  ;;  %v672_v33 = vmul.f32 %v1022_v55, %v1788_v24 }
 0x1f7   :  { %v831_v7 = vadd.f32 %v737_v43, %v670_v14  ;;  %v832_v62 = vadd.f32 %v737_v43, %v671_v56  ;;  %v673_v14 = vmul.f32 %v1023_v37, %v1788_v24  ;;  %v686_v56 = vmul.f32 %v1024_v34, %v1802_v38  ;;  %v1025_v43 = vld [vmem:[%s2021_s0 + $0xe8] sm:$0xff] }
 0x1f9   :  { %877 = vst [vmem:[#allocation2 + $0x60] sm:$0xff] %v831_v7  ;;  %878 = vst.msk [vmem:[#allocation2 + $0x68] sm:$0xff] %vm58_vm0, %v832_v62  ;;  %v687_v7 = vmul.f32 %v1025_v43, %v1802_v38  ;;  %v1027_v38 = vld [vmem:[%s2021_s0 + $0x98] sm:$0xff] }
 0x1fa   :  { %v712_v53 = vpop.permute.xlu1 %711  ;;  %v747_v63 = vpop.permute.xlu0 %746  ;;  %v677_v60 = vmul.f32 %v1027_v38, %v1784_v36  ;;  %v1044_v38 = vld [vmem:[%s2021_s0 + $0x130] sm:$0xff] }
 0x1fb   :  { %v821_v9 = vadd.f32 %v712_v53, %v660_v47  ;;  %v822_v58 = vadd.f32 %v712_v53, %v661_v13  ;;  %v835_v4 = vadd.f32 %v747_v63, %v674_v50  ;;  %v836_v46 = vadd.f32 %v747_v63, %v675_v1  ;;  %v1028_v1 = vld [vmem:[%s2021_s0 + $0x100] sm:$0xff]  ;;  %v1029_v63 = vld [vmem:[%s2021_s0 + $0x108] sm:$0xff] }
 0x1fc   :  { %v676_v50 = vmul.f32 %v1026_v12, %v1784_v36  ;;  %v690_v53 = vmul.f32 %v1028_v1, %v1812_v57  ;;  %v1045_v1 = vld [vmem:[%s2021_s0 + $0x138] sm:$0xff] }
 0x1fd   :  { %867 = vst [vmem:[#allocation2 + $0x10] sm:$0xff] %v821_v9  ;;  %868 = vst.msk [vmem:[#allocation2 + $0x18] sm:$0xff] %vm58_vm0, %v822_v58  ;;  %v691_v9 = vmul.f32 %v1029_v63, %v1812_v57  ;;  %v1031_v57 = vld [vmem:[%s2021_s0 + $0xb8] sm:$0xff] }
 0x1fe   :  { %881 = vst [vmem:[#allocation2 + $0x80] sm:$0xff] %v835_v4  ;;  %882 = vst.msk [vmem:[#allocation2 + $0x88] sm:$0xff] %vm58_vm0, %v836_v46  ;;  %v722_v15 = vpop.permute.xlu1 %721  ;;  %v757_v21 = vpop.permute.xlu0 %756  ;;  %v681_v25 = vmul.f32 %v1031_v57, %v1786_v20 }
 0x1ff   :  { %v825_v0 = vadd.f32 %v722_v15, %v664_v8  ;;  %v826_v28 = vadd.f32 %v722_v15, %v665_v2  ;;  %v839_v44 = vadd.f32 %v757_v21, %v678_v51  ;;  %v840_v5 = vadd.f32 %v757_v21, %v679_v59  ;;  %v1032_v51 = vld [vmem:[%s2021_s0 + $0x120] sm:$0xff]  ;;  %v1033_v59 = vld [vmem:[%s2021_s0 + $0x128] sm:$0xff] }
 0x200   :  { %v680_v2 = vmul.f32 %v1030_v19, %v1786_v20  ;;  %v694_v45 = vmul.f32 %v1032_v51, %v1821_v39  ;;  %v695_v15 = vmul.f32 %v1033_v59, %v1821_v39  ;;  %v1035_v39 = vld [vmem:[%s2021_s0 + $0xd8] sm:$0xff] }
 0x201   :  { %871 = vst [vmem:[#allocation2 + $0x30] sm:$0xff] %v825_v0  ;;  %872 = vst.msk [vmem:[#allocation2 + $0x38] sm:$0xff] %vm58_vm0, %v826_v28  ;;  %v685_v22 = vmul.f32 %v1035_v39, %v1790_v27 }
 0x202   :  { %885 = vst [vmem:[#allocation2 + $0xa0] sm:$0xff] %v839_v44  ;;  %886 = vst.msk [vmem:[#allocation2 + $0xa8] sm:$0xff] %vm58_vm0, %v840_v5  ;;  %v732_v10 = vpop.permute.xlu1 %731  ;;  %v767_v52 = vpop.permute.xlu0 %766 }
 0x203   :  { %v829_v54 = vadd.f32 %v732_v10, %v668_v40  ;;  %v830_v49 = vadd.f32 %v732_v10, %v669_v48  ;;  %v843_v41 = vadd.f32 %v767_v52, %v682_v18  ;;  %v844_v32 = vadd.f32 %v767_v52, %v683_v31  ;;  %v1036_v48 = vld [vmem:[%s2021_s0 + $0x140] sm:$0xff]  ;;  %v1037_v18 = vld [vmem:[%s2021_s0 + $0x148] sm:$0xff] }
 0x204   :  { %v684_v40 = vmul.f32 %v1034_v11, %v1790_v27  ;;  %v698_v61 = vmul.f32 %v1036_v48, %v1830_v26  ;;  %v699_v3 = vmul.f32 %v1037_v18, %v1830_v26  ;;  %v1039_v26 = vld [vmem:[%s2021_s0 + $0xf8] sm:$0xff] }
 0x205   :  { %875 = vst [vmem:[#allocation2 + $0x50] sm:$0xff] %v829_v54  ;;  %876 = vst.msk [vmem:[#allocation2 + $0x58] sm:$0xff] %vm58_vm0, %v830_v49  ;;  %v689_v55 = vmul.f32 %v1039_v26, %v1792_v6 }
 0x206   :  { %889 = vst [vmem:[#allocation2 + $0xc0] sm:$0xff] %v843_v41  ;;  %890 = vst.msk [vmem:[#allocation2 + $0xc8] sm:$0xff] %vm58_vm0, %v844_v32  ;;  %v742_v62 = vpop.permute.xlu1 %741  ;;  %v777_v24 = vpop.permute.xlu0 %776  ;;  %v1038_v41 = vld [vmem:[%s2021_s0 + $0xf0] sm:$0xff] }
 0x207   :  { %v833_v42 = vadd.f32 %v742_v62, %v672_v33  ;;  %v834_v47 = vadd.f32 %v742_v62, %v673_v14  ;;  %v847_v35 = vadd.f32 %v777_v24, %v686_v56  ;;  %v848_v13 = vadd.f32 %v777_v24, %v687_v7  ;;  %v1040_v33 = vld [vmem:[%s2021_s0 + $0x160] sm:$0xff]  ;;  %v1041_v14 = vld [vmem:[%s2021_s0 + $0x168] sm:$0xff] }
 0x208   :  { %v688_v32 = vmul.f32 %v1038_v41, %v1792_v6  ;;  %v702_v37 = vmul.f32 %v1040_v33, %v1839_v30  ;;  %v703_v34 = vmul.f32 %v1041_v14, %v1839_v30  ;;  %v1043_v30 = vld [vmem:[%s2021_s0 + $0x118] sm:$0xff] }
 0x209   :  { %879 = vst [vmem:[#allocation2 + $0x70] sm:$0xff] %v833_v42  ;;  %880 = vst.msk [vmem:[#allocation2 + $0x78] sm:$0xff] %vm58_vm0, %v834_v47  ;;  %v1042_v42 = vld [vmem:[%s2021_s0 + $0x110] sm:$0xff] }
 0x20a   :  { %893 = vst [vmem:[#allocation2 + $0xe0] sm:$0xff] %v847_v35  ;;  %894 = vst.msk [vmem:[#allocation2 + $0xe8] sm:$0xff] %vm58_vm0, %v848_v13  ;;  %v752_v58 = vpop.permute.xlu1 %751  ;;  %v787_v36 = vpop.permute.xlu0 %786  ;;  %v692_v47 = vmul.f32 %v1042_v42, %v1796_v29  ;;  %v693_v35 = vmul.f32 %v1043_v30, %v1796_v29  ;;  %v697_v29 = vmul.f32 %v1045_v1, %v1800_v23 }
 0x20b   :  { %v837_v4 = vadd.f32 %v752_v58, %v676_v50  ;;  %v838_v46 = vadd.f32 %v752_v58, %v677_v60  ;;  %v851_v16 = vadd.f32 %v787_v36, %v690_v53  ;;  %v852_v8 = vadd.f32 %v787_v36, %v691_v9  ;;  %v1046_v58 = vld [vmem:[%s2021_s0 + $0x150] sm:$0xff] }
 0x20c   :  { %v696_v60 = vmul.f32 %v1044_v38, %v1800_v23  ;;  %v700_v36 = vmul.f32 %v1046_v58, %v1804_v17 }
 0x20d   :  { %883 = vst [vmem:[#allocation2 + $0x90] sm:$0xff] %v837_v4  ;;  %884 = vst.msk [vmem:[#allocation2 + $0x98] sm:$0xff] %vm58_vm0, %v838_v46  ;;  %v1047_v4 = vld [vmem:[%s2021_s0 + $0x158] sm:$0xff] }
 0x20e   :  { %897 = vst [vmem:[#allocation2 + $0x100] sm:$0xff] %v851_v16  ;;  %898 = vst.msk [vmem:[#allocation2 + $0x108] sm:$0xff] %vm58_vm0, %v852_v8  ;;  %v762_v21 = vpop.permute.xlu1 %761  ;;  %v797_v20 = vpop.permute.xlu0 %796  ;;  %v701_v23 = vmul.f32 %v1047_v4, %v1804_v17 }
 0x20f   :  { %v841_v0 = vadd.f32 %v762_v21, %v680_v2  ;;  %v842_v28 = vadd.f32 %v762_v21, %v681_v25  ;;  %v855_v44 = vadd.f32 %v797_v20, %v694_v45  ;;  %v856_v5 = vadd.f32 %v797_v20, %v695_v15 }
 0x211   :  { %887 = vst [vmem:[#allocation2 + $0xb0] sm:$0xff] %v841_v0  ;;  %888 = vst.msk [vmem:[#allocation2 + $0xb8] sm:$0xff] %vm58_vm0, %v842_v28 }
 0x212   :  { %901 = vst [vmem:[#allocation2 + $0x120] sm:$0xff] %v855_v44  ;;  %902 = vst.msk [vmem:[#allocation2 + $0x128] sm:$0xff] %vm58_vm0, %v856_v5  ;;  %v772_v31 = vpop.permute.xlu1 %771  ;;  %v807_v27 = vpop.permute.xlu0 %806 }
 0x213   :  { %v845_v10 = vadd.f32 %v772_v31, %v684_v40  ;;  %v846_v52 = vadd.f32 %v772_v31, %v685_v22  ;;  %v859_v54 = vadd.f32 %v807_v27, %v698_v61  ;;  %v860_v49 = vadd.f32 %v807_v27, %v699_v3 }
 0x215   :  { %891 = vst [vmem:[#allocation2 + $0xd0] sm:$0xff] %v845_v10  ;;  %892 = vst.msk [vmem:[#allocation2 + $0xd8] sm:$0xff] %vm58_vm0, %v846_v52 }
 0x216   :  { %905 = vst [vmem:[#allocation2 + $0x140] sm:$0xff] %v859_v54  ;;  %906 = vst.msk [vmem:[#allocation2 + $0x148] sm:$0xff] %vm58_vm0, %v860_v49  ;;  %v782_v56 = vpop.permute.xlu1 %781  ;;  %v817_v6 = vpop.permute.xlu0 %816 }
 0x217   :  { %v849_v43 = vadd.f32 %v782_v56, %v688_v32  ;;  %v850_v7 = vadd.f32 %v782_v56, %v689_v55  ;;  %v863_v62 = vadd.f32 %v817_v6, %v702_v37  ;;  %v864_v24 = vadd.f32 %v817_v6, %v703_v34 }
 0x219   :  { %895 = vst [vmem:[#allocation2 + $0xf0] sm:$0xff] %v849_v43  ;;  %896 = vst.msk [vmem:[#allocation2 + $0xf8] sm:$0xff] %vm58_vm0, %v850_v7 }
 0x21a   :  { %909 = vst [vmem:[#allocation2 + $0x160] sm:$0xff] %v863_v62  ;;  %910 = vst.msk [vmem:[#allocation2 + $0x168] sm:$0xff] %vm58_vm0, %v864_v24  ;;  %v792_v13 = vpop.permute.xlu1 %791 }
 0x21b   :  { %v853_v12 = vadd.f32 %v792_v13, %v692_v47  ;;  %v854_v50 = vadd.f32 %v792_v13, %v693_v35 }
 0x21d   :  { %899 = vst [vmem:[#allocation2 + $0x110] sm:$0xff] %v853_v12  ;;  %900 = vst.msk [vmem:[#allocation2 + $0x118] sm:$0xff] %vm58_vm0, %v854_v50 }
 0x21e   :  { %v802_v53 = vpop.permute.xlu1 %801 }
 0x21f   :  { %v857_v63 = vadd.f32 %v802_v53, %v696_v60  ;;  %v858_v9 = vadd.f32 %v802_v53, %v697_v29 }
 0x221   :  { %903 = vst [vmem:[#allocation2 + $0x130] sm:$0xff] %v857_v63  ;;  %904 = vst.msk [vmem:[#allocation2 + $0x138] sm:$0xff] %vm58_vm0, %v858_v9 }
 0x222   :  { %v812_v46 = vpop.permute.xlu1 %811 }
 0x223   :  { %v861_v16 = vadd.f32 %v812_v46, %v700_v36  ;;  %v862_v8 = vadd.f32 %v812_v46, %v701_v23 }
 0x225   :  { %907 = vst [vmem:[#allocation2 + $0x150] sm:$0xff] %v861_v16  ;;  %908 = vst.msk [vmem:[#allocation2 + $0x158] sm:$0xff] %vm58_vm0, %v862_v8 }
 0x226   :  { %1059 = shalt.err (!%p1056_p4)
}
 0x227   :  { %s1060_s5 = scalar_lea.hbm %s2023_s2, 5888 }
 0x228   :  { %p1061_p5 = scmp.ne.s32.totalorder %s2023_s2, %s1060_s5  ;;  %p1064_p6 = scmp.lt.u32.totalorder %s1060_s5, %s2023_s2 }
 0x22a   :  { %p1066_p7 = pnand %p1064_p6, %p1061_p5 }
 0x22c   :  { %1069 = shalt.err (!%p1066_p7)
}
 0x22d   :  { %s1074_s10 = smov 256   ;;  %s1075_s11 = smov 16  }
 0x22e   :  { %922 = dma.vmem_to_hbm [thread:$0]  %s917_s26, 5888, %s2023_s2, [#allocation3], %s1074_s10, %s1074_s10, %s1075_s11  }
 0x22f   :  { %1070 = dma.done.wait [#allocation3], 5888  }
 0x230   :  { %1071 = vsyncadd [#allocation3], 4294961408 }
 0x231   :  { %926 = vsyncpa [#allocation3], 1 }

</bundles_post_ra>
